<compile_context>
chip_gen: v5e
topology: v5e:2x2
jax: 0.10.0
libtpu: 0.0.40
codegen_flags: <defaults>
</compile_context>

<pallas_src>
import jax
import jax.numpy as jnp
from jax.experimental import pallas as pl
from jax.experimental.pallas import tpu as pltpu


def _fc_kernel(x_ref, w_ref, b_ref, o_ref):
    """Grid = (N tiles, K tiles).  o_ref (f32) is resident across the K axis."""
    k = pl.program_id(1)

    @pl.when(k == 0)
    def _():
        # Initialize the accumulator (the output block itself) with the bias.
        o_ref[...] = jnp.broadcast_to(b_ref[...], o_ref.shape)

    # (B, tk) x (tn, tk) -> (B, tn): contract last dims, accumulate in f32.
    o_ref[...] += jax.lax.dot_general(
        x_ref[...],
        w_ref[...],
        dimension_numbers=(((1,), (1,)), ((), ())),
        preferred_element_type=jnp.float32,
    )


def _round_up(v, m):
    return ((v + m - 1) // m) * m


def _pick_tile(total, candidates):
    """Largest candidate that divides `total` (total is a multiple of 128)."""
    for c in candidates:
        if total % c == 0:
            return min(c, total)
    return total


def prepare_fc_params(weight, bias, *, compute_dtype=jnp.bfloat16):
    """One-time parameter prep (in real use do this outside the hot path):
    keep the native (N, K) layout, pad N up to a multiple of 128 so the
    output is lane-dense, cast the weight to the compute dtype.  Bias stays
    f32 (it is tiny and is added to the f32 accumulator)."""
    n_out, _ = weight.shape
    n_pad = _round_up(n_out, 128)
    w = weight.astype(compute_dtype)
    b = bias.astype(jnp.float32)
    if n_pad != n_out:
        w = jnp.pad(w, ((0, n_pad - n_out), (0, 0)))
        b = jnp.pad(b, ((0, n_pad - n_out),))
    return w, b.reshape(1, n_pad)


def fully_connect_layer(x, weight, bias, *, compute_dtype=jnp.bfloat16, tk_max=2048):
    """Pallas equivalent of FullyConnectLayer.forward.

    x:      array with >= 2 dims; flattened to (B, prod(rest)) (torch .view).
    weight: (out_channels, in_channels)  -- PyTorch nn.Linear layout.
    bias:   (out_channels,)
    """
    assert x.ndim >= 2, "FullyConnectLayer input error: need >= 2 dims"
    batch = x.shape[0]
    k_in = 1
    for d in x.shape[1:]:
        k_in *= d
    n_out, k_w = weight.shape
    assert k_w == k_in, "in_channels must equal flattened feature size"

    out_dtype = x.dtype

    # --- parameter / activation prep (pad + cast; weight prep is one-time) ---
    w_p, b_p = prepare_fc_params(weight, bias, compute_dtype=compute_dtype)
    n_pad = w_p.shape[0]

    k_pad = _round_up(k_in, 128)
    tk = _pick_tile(k_pad, (tk_max, 1024, 512, 256, 128))
    tn = _pick_tile(n_pad, (512, 256, 128))

    x_flat = x.reshape(batch, k_in).astype(compute_dtype)
    if k_pad != k_in:
        x_flat = jnp.pad(x_flat, ((0, 0), (0, k_pad - k_in)))
        w_p = jnp.pad(w_p, ((0, 0), (0, k_pad - k_in)))

    grid = (n_pad // tn, k_pad // tk)

    # VMEM budget: double-buffered input tiles + resident f32 output tile.
    bytes_c = jnp.dtype(compute_dtype).itemsize
    tile_bytes = (batch * tk * bytes_c      # x tile
                  + tn * tk * bytes_c       # weight tile
                  + 8 * tn * 4              # bias tile (sublane padded)
                  + batch * tn * 4)         # output/accumulator tile
    vmem_limit = int(min(48 * 1024 * 1024, max(4 * tile_bytes, 16 * 1024 * 1024)))

    out = pl.pallas_call(
        _fc_kernel,
        out_shape=jax.ShapeDtypeStruct((batch, n_pad), jnp.float32),
        grid_spec=pltpu.PrefetchScalarGridSpec(
            num_scalar_prefetch=0,
            grid=grid,
            in_specs=[
                pl.BlockSpec((batch, tk), lambda n, k: (0, k)),   # x tile
                pl.BlockSpec((tn, tk), lambda n, k: (n, k)),      # W in native (N, K)
                pl.BlockSpec((1, tn), lambda n, k: (0, n)),       # bias tile
            ],
            out_specs=pl.BlockSpec((batch, tn), lambda n, k: (0, n)),
        ),
        compiler_params=pltpu.CompilerParams(
            dimension_semantics=("parallel", "arbitrary"),
            vmem_limit_bytes=vmem_limit,
        ),
    )(x_flat, w_p, b_p)

    out = out[:, :n_out]
    if out.dtype != out_dtype:
        out = out.astype(out_dtype)
    return out


if __name__ == "__main__":
    key = jax.random.PRNGKey(0)
    kx, kw, kb = jax.random.split(key, 3)

    # Small NCHW input: B=2, C=4, H=16, W=16 -> in_channels = 4*16*16 = 1024
    B, C, H, W = 2, 4, 16, 16
    in_channels = C * H * W
    out_channels = 32

    x = jax.random.normal(kx, (B, C, H, W), dtype=jnp.float32)
    # Deterministic synthetic parameters (PyTorch Linear shapes).
    weight = jax.random.normal(kw, (out_channels, in_channels), dtype=jnp.float32) * 0.02
    bias = jax.random.normal(kb, (out_channels,), dtype=jnp.float32) * 0.02

    y = fully_connect_layer(x, weight, bias)
    y = jax.block_until_ready(y)

    assert y.shape == (B, out_channels)
    assert y.dtype == x.dtype

    # Reference at the same compute precision (bf16 inputs, f32 accumulate).
    xf = x.reshape(B, -1).astype(jnp.bfloat16).astype(jnp.float32)
    wf = weight.astype(jnp.bfloat16).astype(jnp.float32)
    y_ref = xf @ wf.T + bias
    assert jnp.allclose(y, y_ref, atol=1e-3, rtol=1e-3), float(jnp.max(jnp.abs(y - y_ref)))

    # Loose check against the full-f32 reference as well.
    y_ref_f32 = x.reshape(B, -1) @ weight.T + bias
    assert jnp.allclose(y, y_ref_f32, atol=3e-2, rtol=3e-2)

    print("KERNEL_OK")
</pallas_src>

<mosaic_0001>
module attributes {stable_mosaic.version = 11 : i64} {
  func.func @_fc_kernel(%arg0: i32, %arg1: i32, %arg2: memref<2x1024xbf16, #tpu.memory_space<vmem>>, %arg3: memref<128x1024xbf16, #tpu.memory_space<vmem>>, %arg4: memref<1x128xf32, #tpu.memory_space<vmem>>, %arg5: memref<2x128xf32, #tpu.memory_space<vmem>>) attributes {dimension_semantics = [#tpu.dimension_semantics<parallel>, #tpu.dimension_semantics<arbitrary>], iteration_bounds = array<i64: 1, 1>, scalar_prefetch = 0 : i64, scratch_operands = 0 : i64, tpu.core_type = #tpu.core_type<tc>, window_params = [{transform_indices = @transform_0, window_bounds = array<i64: 2, 1024>}, {transform_indices = @transform_1, window_bounds = array<i64: 128, 1024>}, {transform_indices = @transform_2, window_bounds = array<i64: 1, 128>}, {transform_indices = @transform_3, window_bounds = array<i64: 2, 128>}]} {
    %c0_i32 = arith.constant 0 : i32
    %0 = arith.cmpi eq, %arg1, %c0_i32 : i32
    %1 = arith.extui %0 : i1 to i32
    %c0_i32_0 = arith.constant 0 : i32
    %2 = arith.cmpi ne, %1, %c0_i32_0 : i32
    scf.if %2 {
      %c0_8 = arith.constant 0 : index
      %c0_9 = arith.constant 0 : index
      %9 = vector.load %arg4[%c0_8, %c0_9] : memref<1x128xf32, #tpu.memory_space<vmem>>, vector<1x128xf32>
      %10 = vector.shape_cast %9 : vector<1x128xf32> to vector<1x128xf32>
      %11 = vector.broadcast %10 : vector<1x128xf32> to vector<2x128xf32>
      %c0_10 = arith.constant 0 : index
      %c0_11 = arith.constant 0 : index
      %12 = vector.load %arg5[%c0_10, %c0_11] : memref<2x128xf32, #tpu.memory_space<vmem>>, vector<2x128xf32>
      tpu.vector_store %arg5[%c0_10, %c0_11], %11 {strides = array<i32>} : memref<2x128xf32, #tpu.memory_space<vmem>>, vector<2x128xf32>,
    } else {
    }
    %c0 = arith.constant 0 : index
    %c0_1 = arith.constant 0 : index
    %3 = vector.load %arg5[%c0, %c0_1] : memref<2x128xf32, #tpu.memory_space<vmem>>, vector<2x128xf32>
    %c0_2 = arith.constant 0 : index
    %c0_3 = arith.constant 0 : index
    %4 = vector.load %arg2[%c0_2, %c0_3] : memref<2x1024xbf16, #tpu.memory_space<vmem>>, vector<2x1024xbf16>
    %c0_4 = arith.constant 0 : index
    %c0_5 = arith.constant 0 : index
    %5 = vector.load %arg3[%c0_4, %c0_5] : memref<128x1024xbf16, #tpu.memory_space<vmem>>, vector<128x1024xbf16>
    %cst = arith.constant dense<0.000000e+00> : vector<2x128xf32>
    %6 = tpu.matmul %4, %5, %cst {dimension_numbers = #tpu.dot_dimension_numbers<[1], [1], [0], [0], [0, 0, 1, 0], [], []>} : vector<2x1024xbf16>, vector<128x1024xbf16>, vector<2x128xf32> -> vector<2x128xf32>
    %7 = arith.addf %3, %6 : vector<2x128xf32>
    %c0_6 = arith.constant 0 : index
    %c0_7 = arith.constant 0 : index
    %8 = vector.load %arg5[%c0_6, %c0_7] : memref<2x128xf32, #tpu.memory_space<vmem>>, vector<2x128xf32>
    tpu.vector_store %arg5[%c0_6, %c0_7], %7 {strides = array<i32>} : memref<2x128xf32, #tpu.memory_space<vmem>>, vector<2x128xf32>,
    return
  }
  func.func @transform_0(%arg0: i32, %arg1: i32) -> (i32, i32) {
    %c0_i32 = arith.constant 0 : i32
    %c0_i32_0 = arith.constant 0 : i32
    return %c0_i32, %arg1 : i32, i32
  }
  func.func @transform_1(%arg0: i32, %arg1: i32) -> (i32, i32) {
    %c0_i32 = arith.constant 0 : i32
    return %arg0, %arg1 : i32, i32
  }
  func.func @transform_2(%arg0: i32, %arg1: i32) -> (i32, i32) {
    %c0_i32 = arith.constant 0 : i32
    %c0_i32_0 = arith.constant 0 : i32
    return %c0_i32, %arg0 : i32, i32
  }
  func.func @transform_3(%arg0: i32, %arg1: i32) -> (i32, i32) {
    %c0_i32 = arith.constant 0 : i32
    %c0_i32_0 = arith.constant 0 : i32
    return %c0_i32, %arg0 : i32, i32
  }
}

</mosaic_0001>

<bundles_post_ra>
// kernel: tpu_custom_call.1
= control target key start
LH: loop header
LB: loop body
LE: loop exit
PB: predicated region body
PF: predicated region fallthrough
CT: control target
= control target key end

     0   :  { %8 = vsyncpa [#allocation3], 0  ;;  %s1023_s0 = inlined_call_operand.hbm [shape: bf16[2,1024], index: 0, kind: input, shape index: {}]   ;;  %s1024_s1 = inlined_call_operand.hbm [shape: bf16[128,1024], index: 1, kind: input, shape index: {}]   ;;  %s1025_s2 = inlined_call_operand.vmem [shape: f32[1,128], index: 2, kind: input, shape index: {}]   ;;  %s1026_s3 = inlined_call_operand.hbm [shape: f32[2,128], index: 3, kind: output, shape index: {}]  }
   0x1   :  { %9 = vsyncpa [#allocation6], 0 }
   0x2   :  { %10 = vsyncpa [#allocation4], 0  ;;  %s16_s14 = sshll.u32 %s1023_s0, 4  ;;  %s986_s15 = smov [#allocation2]   ;;  %s17_s14 = int_to_ptr.hbm [resolvable:$true] %s16_s14 }
   0x3   :  { %s18_s16 = sshll.u32 %s986_s15, 4  ;;  %s26_s19 = sshll.u32 %s1024_s1, 4  ;;  %s19_s16 = int_to_ptr.vmem [resolvable:$true] %s18_s16  ;;  %s27_s19 = int_to_ptr.hbm [resolvable:$true] %s26_s19 }
   0x4   :  { %21 = dma.hbm_to_vmem [thread:$0]  %s17_s14, 128, %s19_s16, [#allocation3]  }
   0x5   :  { %s987_s20 = smov [#allocation5]   ;;  %s988_s22 = smov 512  }
   0x6   :  { %s28_s21 = sshll.u32 %s987_s20, 4  ;;  %s989_s23 = smov 32   ;;  %s29_s21 = int_to_ptr.vmem [resolvable:$true] %s28_s21 }
   0x7   :  { %34 = dma.hbm_to_vmem [thread:$0]  %s27_s19, 8192, %s29_s21, [#allocation6], %s988_s22, %s988_s22, %s989_s23  }
   0x8   :  { %980 = dma.done.wait [#allocation3], 128  }
   0x9   :  { %981 = vsyncadd [#allocation3], 4294967168 }
   0xa   :  { %982 = dma.done.wait [#allocation6], 8192  }
   0xb   :  { %983 = vsyncadd [#allocation6], 4294959104  ;;  %v808_v0 = vld [vmem:[#allocation5 + $0x1c0] sm:$0xf]  ;;  %v894_v2 = vld [vmem:[#allocation5 + $0x1c4] sm:$0xf] }
   0xc   :  { %v898_v1 = vld [vmem:[#allocation5 + $0x1dc] sm:$0xf0]  ;;  %v810_v4 = vld [vmem:[#allocation5 + $0x1e0] sm:$0xf0]  ;;  %v816_v5 = vld [vmem:[#allocation5 + $0x1c8] sm:$0xf] }
   0xd   :  { %v809_v3 = vor.u32 %v898_v1, %v808_v0  ;;  %v899_v6 = vld [vmem:[#allocation5 + $0x1e4] sm:$0xf0]  ;;  %v813_v7 = vor.u32 %v894_v2, %v810_v4  ;;  %v895_v9 = vld [vmem:[#allocation5 + $0x1cc] sm:$0xf]  ;;  %v776_v12 = vld [vmem:[#allocation5 + $0x180] sm:$0xf] }
   0xe   :  { %v817_v8 = vor.u32 %v899_v6, %v816_v5  ;;  %v818_v10 = vld [vmem:[#allocation5 + $0x1e8] sm:$0xf0]  ;;  %v890_v13 = vld [vmem:[#allocation5 + $0x19c] sm:$0xf0]  ;;  %v886_v14 = vld [vmem:[#allocation5 + $0x184] sm:$0xf] }
   0xf   :  { %458 = vmatpush.bf16.xpose.msra.mxu0 %v809_v3  ;;  %v821_v11 = vor.u32 %v895_v9, %v818_v10  ;;  %471 = vmatpush.bf16.xpose.msra.mxu1 %v813_v7  ;;  %v778_v15 = vld [vmem:[#allocation5 + $0x1a0] sm:$0xf0]  ;;  %v784_v16 = vld [vmem:[#allocation5 + $0x188] sm:$0xf]  ;;  %v887_v18 = vld [vmem:[#allocation5 + $0x18c] sm:$0xf]  ;;  %v777_v20 = vor.u32 %v890_v13, %v776_v12 }
  0x10   :  { %484 = vmatpush.bf16.xpose.msra.mxu2 %v817_v8  ;;  %v891_v17 = vld [vmem:[#allocation5 + $0x1a4] sm:$0xf0]  ;;  %v786_v19 = vld [vmem:[#allocation5 + $0x1a8] sm:$0xf0]  ;;  %v781_v21 = vor.u32 %v886_v14, %v778_v15  ;;  %v744_v24 = vld [vmem:[#allocation5 + $0x140] sm:$0xf] }
  0x11   :  { %497 = vmatpush.bf16.xpose.msra.mxu3 %v821_v11  ;;  %v785_v22 = vor.u32 %v891_v17, %v784_v16  ;;  %v789_v23 = vor.u32 %v887_v18, %v786_v19  ;;  %v882_v25 = vld [vmem:[#allocation5 + $0x15c] sm:$0xf0]  ;;  %v878_v26 = vld [vmem:[#allocation5 + $0x144] sm:$0xf]  ;;  %v752_v28 = vld [vmem:[#allocation5 + $0x148] sm:$0xf] }
  0x12   :  { %v746_v27 = vld [vmem:[#allocation5 + $0x160] sm:$0xf0]  ;;  %v883_v29 = vld [vmem:[#allocation5 + $0x164] sm:$0xf0]  ;;  %v879_v30 = vld [vmem:[#allocation5 + $0x14c] sm:$0xf]  ;;  %v745_v32 = vor.u32 %v882_v25, %v744_v24 }
  0x13   :  { %v754_v31 = vld [vmem:[#allocation5 + $0x168] sm:$0xf0]  ;;  %v749_v33 = vor.u32 %v878_v26, %v746_v27  ;;  %v753_v34 = vor.u32 %v883_v29, %v752_v28  ;;  %v712_v36 = vld [vmem:[#allocation5 + $0x100] sm:$0xf]  ;;  %v870_v38 = vld [vmem:[#allocation5 + $0x104] sm:$0xf] }
  0x14   :  { %v757_v35 = vor.u32 %v879_v30, %v754_v31  ;;  %v874_v37 = vld [vmem:[#allocation5 + $0x11c] sm:$0xf0]  ;;  %v714_v39 = vld [vmem:[#allocation5 + $0x120] sm:$0xf0]  ;;  %v720_v40 = vld [vmem:[#allocation5 + $0x108] sm:$0xf] }
  0x15   :  { %v875_v41 = vld [vmem:[#allocation5 + $0x124] sm:$0xf0]  ;;  %v871_v42 = vld [vmem:[#allocation5 + $0x10c] sm:$0xf]  ;;  %v713_v44 = vor.u32 %v874_v37, %v712_v36  ;;  %v717_v45 = vor.u32 %v870_v38, %v714_v39  ;;  %v680_v48 = vld [vmem:[#allocation5 + $0xc0] sm:$0xf] }
  0x16   :  { %v722_v43 = vld [vmem:[#allocation5 + $0x128] sm:$0xf0]  ;;  %v721_v46 = vor.u32 %v875_v41, %v720_v40  ;;  %v866_v49 = vld [vmem:[#allocation5 + $0xdc] sm:$0xf0]  ;;  %v862_v50 = vld [vmem:[#allocation5 + $0xc4] sm:$0xf] }
  0x17   :  { %459 = vmatpush.bf16.xpose.msra.mxu0 %v777_v20  ;;  %472 = vmatpush.bf16.xpose.msra.mxu1 %v781_v21  ;;  %v725_v47 = vor.u32 %v871_v42, %v722_v43  ;;  %v682_v51 = vld [vmem:[#allocation5 + $0xe0] sm:$0xf0]  ;;  %v688_v52 = vld [vmem:[#allocation5 + $0xc8] sm:$0xf]  ;;  %v863_v54 = vld [vmem:[#allocation5 + $0xcc] sm:$0xf]  ;;  %v681_v56 = vor.u32 %v866_v49, %v680_v48 }
  0x18   :  { %485 = vmatpush.bf16.xpose.msra.mxu2 %v785_v22  ;;  %v867_v53 = vld [vmem:[#allocation5 + $0xe4] sm:$0xf0]  ;;  %v690_v55 = vld [vmem:[#allocation5 + $0xe8] sm:$0xf0]  ;;  %v685_v57 = vor.u32 %v862_v50, %v682_v51  ;;  %v648_v60 = vld [vmem:[#allocation5 + $0x80] sm:$0xf] }
  0x19   :  { %498 = vmatpush.bf16.xpose.msra.mxu3 %v789_v23  ;;  %v689_v58 = vor.u32 %v867_v53, %v688_v52  ;;  %v693_v59 = vor.u32 %v863_v54, %v690_v55  ;;  %v858_v61 = vld [vmem:[#allocation5 + $0x9c] sm:$0xf0]  ;;  %v854_v62 = vld [vmem:[#allocation5 + $0x84] sm:$0xf]  ;;  %v656_v0 = vld [vmem:[#allocation5 + $0x88] sm:$0xf] }
  0x1a   :  { %v650_v63 = vld [vmem:[#allocation5 + $0xa0] sm:$0xf0]  ;;  %v859_v1 = vld [vmem:[#allocation5 + $0xa4] sm:$0xf0]  ;;  %v855_v2 = vld [vmem:[#allocation5 + $0x8c] sm:$0xf]  ;;  %v649_v4 = vor.u32 %v858_v61, %v648_v60 }
  0x1b   :  { %v658_v3 = vld [vmem:[#allocation5 + $0xa8] sm:$0xf0]  ;;  %v653_v5 = vor.u32 %v854_v62, %v650_v63  ;;  %v657_v6 = vor.u32 %v859_v1, %v656_v0  ;;  %v616_v8 = vld [vmem:[#allocation5 + $0x40] sm:$0xf]  ;;  %v846_v10 = vld [vmem:[#allocation5 + $0x44] sm:$0xf] }
  0x1c   :  { %v661_v7 = vor.u32 %v855_v2, %v658_v3  ;;  %v850_v9 = vld [vmem:[#allocation5 + $0x5c] sm:$0xf0]  ;;  %v618_v11 = vld [vmem:[#allocation5 + $0x60] sm:$0xf0]  ;;  %v624_v12 = vld [vmem:[#allocation5 + $0x48] sm:$0xf] }
  0x1d   :  { %v851_v13 = vld [vmem:[#allocation5 + $0x64] sm:$0xf0]  ;;  %v847_v14 = vld [vmem:[#allocation5 + $0x4c] sm:$0xf]  ;;  %v617_v16 = vor.u32 %v850_v9, %v616_v8  ;;  %v621_v17 = vor.u32 %v846_v10, %v618_v11  ;;  %v584_v20 = vld [vmem:[#allocation5] sm:$0xf] }
  0x1e   :  { %v626_v15 = vld [vmem:[#allocation5 + $0x68] sm:$0xf0]  ;;  %v625_v18 = vor.u32 %v851_v13, %v624_v12  ;;  %v842_v21 = vld [vmem:[#allocation5 + $0x1c] sm:$0xf0]  ;;  %v838_v22 = vld [vmem:[#allocation5 + $0x4] sm:$0xf] }
  0x1f   :  { %460 = vmatpush.bf16.xpose.msra.mxu0 %v745_v32  ;;  %473 = vmatpush.bf16.xpose.msra.mxu1 %v749_v33  ;;  %v629_v19 = vor.u32 %v847_v14, %v626_v15  ;;  %v586_v23 = vld [vmem:[#allocation5 + $0x20] sm:$0xf0]  ;;  %v592_v24 = vld [vmem:[#allocation5 + $0x8] sm:$0xf]  ;;  %v839_v26 = vld [vmem:[#allocation5 + $0xc] sm:$0xf]  ;;  %v585_v31 = vor.u32 %v842_v21, %v584_v20 }
  0x20   :  { %486 = vmatpush.bf16.xpose.msra.mxu2 %v753_v34  ;;  %v843_v25 = vld [vmem:[#allocation5 + $0x24] sm:$0xf0]  ;;  %v594_v27 = vld [vmem:[#allocation5 + $0x28] sm:$0xf0]  ;;  %v824_v28 = vld [vmem:[#allocation5 + $0x1d0] sm:$0xf] }
  0x21   :  { %499 = vmatpush.bf16.xpose.msra.mxu3 %v757_v35  ;;  %v900_v29 = vld [vmem:[#allocation5 + $0x1ec] sm:$0xf0]  ;;  %v896_v30 = vld [vmem:[#allocation5 + $0x1d4] sm:$0xf]  ;;  %v832_v33 = vld [vmem:[#allocation5 + $0x1d8] sm:$0xf]  ;;  %v589_v35 = vor.u32 %v838_v22, %v586_v23  ;;  %v593_v36 = vor.u32 %v843_v25, %v592_v24  ;;  %v597_v39 = vor.u32 %v839_v26, %v594_v27 }
  0x22   :  { %v826_v32 = vld [vmem:[#allocation5 + $0x1f0] sm:$0xf0]  ;;  %v901_v34 = vld [vmem:[#allocation5 + $0x1f4] sm:$0xf0]  ;;  %v897_v37 = vld [vmem:[#allocation5 + $0x1dc] sm:$0xf]  ;;  %v825_v40 = vor.u32 %v900_v29, %v824_v28 }
  0x23   :  { %v834_v38 = vld [vmem:[#allocation5 + $0x1f8] sm:$0xf0]  ;;  %v829_v41 = vor.u32 %v896_v30, %v826_v32  ;;  %v833_v42 = vor.u32 %v901_v34, %v832_v33  ;;  %v800_v49 = vld [vmem:[#allocation5 + $0x198] sm:$0xf]  ;;  %v762_v60 = vld [vmem:[#allocation5 + $0x170] sm:$0xf0] }
  0x24   :  { %v837_v43 = vor.u32 %v897_v37, %v834_v38  ;;  %v55_v48 = vld [vmem:[#allocation2] sm:$0xff]  ;;  %v728_v9 = vld [vmem:[#allocation5 + $0x110] sm:$0xf]  ;;  %v872_v11 = vld [vmem:[#allocation5 + $0x114] sm:$0xf]  ;;  %s990_s24 = smov [#allocation7]  }
  0x25   :  { %v893_v50 = vld [vmem:[#allocation5 + $0x1b4] sm:$0xf0]  ;;  %121 = vst [vmem:[#allocation1] ss:$9 sm:$0xff] %v55_v48  ;;  %v889_v51 = vld [vmem:[#allocation5 + $0x19c] sm:$0xf] }
  0x26   :  { %v802_v52 = vld [vmem:[#allocation5 + $0x1b8] sm:$0xf0]  ;;  %v801_v55 = vor.u32 %v893_v50, %v800_v49  ;;  %v768_v61 = vld [vmem:[#allocation5 + $0x158] sm:$0xf]  ;;  %v876_v10 = vld [vmem:[#allocation5 + $0x12c] sm:$0xf0] }
  0x27   :  { %461 = vmatpush.bf16.xpose.msra.mxu0 %v713_v44  ;;  %474 = vmatpush.bf16.xpose.msra.mxu1 %v717_v45  ;;  %v792_v44 = vld [vmem:[#allocation5 + $0x190] sm:$0xf]  ;;  %v885_v0 = vld [vmem:[#allocation5 + $0x174] sm:$0xf0]  ;;  %v881_v3 = vld [vmem:[#allocation5 + $0x15c] sm:$0xf] }
  0x28   :  { %487 = vmatpush.bf16.xpose.msra.mxu2 %v721_v46  ;;  %v892_v45 = vld [vmem:[#allocation5 + $0x1ac] sm:$0xf0]  ;;  %v888_v46 = vld [vmem:[#allocation5 + $0x194] sm:$0xf]  ;;  %v736_v13 = vld [vmem:[#allocation5 + $0x118] sm:$0xf] }
  0x29   :  { %500 = vmatpush.bf16.xpose.msra.mxu3 %v725_v47  ;;  %v794_v47 = vld [vmem:[#allocation5 + $0x1b0] sm:$0xf0]  ;;  %v793_v53 = vor.u32 %v892_v45, %v792_v44  ;;  %v877_v14 = vld [vmem:[#allocation5 + $0x134] sm:$0xf0]  ;;  %v873_v15 = vld [vmem:[#allocation5 + $0x11c] sm:$0xf] }
  0x2a   :  { %v797_v54 = vor.u32 %v888_v46, %v794_v47  ;;  %v730_v12 = vld [vmem:[#allocation5 + $0x130] sm:$0xf0]  ;;  %v696_v21 = vld [vmem:[#allocation5 + $0xd0] sm:$0xf]  ;;  %v704_v25 = vld [vmem:[#allocation5 + $0xd8] sm:$0xf] }
  0x2b   :  { %v868_v22 = vld [vmem:[#allocation5 + $0xec] sm:$0xf0]  ;;  %v864_v23 = vld [vmem:[#allocation5 + $0xd4] sm:$0xf]  ;;  %v869_v26 = vld [vmem:[#allocation5 + $0xf4] sm:$0xf0] }
  0x2c   :  { %v124_v62 = vld [vmem:[#allocation1 + $0x12] sm:$0xff]  ;;  %v125_v63 = vld [vmem:[#allocation1 + $0x1b] sm:$0xff]  ;;  %v123_v2 = vld [vmem:[#allocation1 + $0x9] sm:$0xff]  ;;  %v697_v29 = vor.u32 %v868_v22, %v696_v21  ;;  %s569_s25 = sshll.u32 %s990_s24, 4  ;;  %s570_s25 = int_to_ptr.vmem [resolvable:$true] %s569_s25 }
  0x2d   :  { %v122_v1 = vld [vmem:[#allocation1] sm:$0xff]  ;;  %v865_v27 = vld [vmem:[#allocation5 + $0xdc] sm:$0xf]  ;;  %v672_v37 = vld [vmem:[#allocation5 + $0x98] sm:$0xf] }
  0x2e   :  { %v698_v24 = vld [vmem:[#allocation5 + $0xf0] sm:$0xf0]  ;;  %v706_v28 = vld [vmem:[#allocation5 + $0xf8] sm:$0xf0]  ;;  %v664_v33 = vld [vmem:[#allocation5 + $0x90] sm:$0xf] }
  0x2f   :  { %462 = vmatpush.bf16.xpose.msra.mxu0 %v681_v56  ;;  %475 = vmatpush.bf16.xpose.msra.mxu1 %v685_v57  ;;  %v805_v56 = vor.u32 %v889_v51, %v802_v52  ;;  %v760_v57 = vld [vmem:[#allocation5 + $0x150] sm:$0xf]  ;;  %v701_v30 = vor.u32 %v864_v23, %v698_v24  ;;  %v709_v32 = vor.u32 %v865_v27, %v706_v28  ;;  %v861_v38 = vld [vmem:[#allocation5 + $0xb4] sm:$0xf0]  ;;  %v848_v47 = vld [vmem:[#allocation5 + $0x54] sm:$0xf] }
  0x30   :  { %488 = vmatpush.bf16.xpose.msra.mxu2 %v689_v58  ;;  %v884_v58 = vld [vmem:[#allocation5 + $0x16c] sm:$0xf0]  ;;  %v634_v48 = vld [vmem:[#allocation5 + $0x70] sm:$0xf0]  ;;  %v640_v49 = vld [vmem:[#allocation5 + $0x58] sm:$0xf] }
  0x31   :  { %501 = vmatpush.bf16.xpose.msra.mxu3 %v693_v59  ;;  %v880_v59 = vld [vmem:[#allocation5 + $0x154] sm:$0xf]  ;;  %v860_v34 = vld [vmem:[#allocation5 + $0xac] sm:$0xf0]  ;;  %v853_v50 = vld [vmem:[#allocation5 + $0x74] sm:$0xf0] }
  0x32   :  { %v632_v45 = vld [vmem:[#allocation5 + $0x50] sm:$0xf]  ;;  %v849_v51 = vld [vmem:[#allocation5 + $0x5c] sm:$0xf] }
  0x33   :  { %v852_v46 = vld [vmem:[#allocation5 + $0x6c] sm:$0xf0]  ;;  %v642_v52 = vld [vmem:[#allocation5 + $0x78] sm:$0xf0] }
  0x37   :  { %463 = vmatpush.bf16.xpose.msra.mxu0 %v649_v4  ;;  %476 = vmatpush.bf16.xpose.msra.mxu1 %v653_v5  ;;  %v770_v4 = vld [vmem:[#allocation5 + $0x178] sm:$0xf0]  ;;  %v761_v5 = vor.u32 %v884_v58, %v760_v57  ;;  %v600_v57 = vld [vmem:[#allocation5 + $0x10] sm:$0xf] }
  0x38   :  { %489 = vmatpush.bf16.xpose.msra.mxu2 %v657_v6  ;;  %v765_v6 = vor.u32 %v880_v59, %v762_v60  ;;  %v773_v8 = vor.u32 %v881_v3, %v770_v4  ;;  %v844_v58 = vld [vmem:[#allocation5 + $0x2c] sm:$0xf0]  ;;  %v840_v59 = vld [vmem:[#allocation5 + $0x14] sm:$0xf] }
  0x39   :  { %502 = vmatpush.bf16.xpose.msra.mxu3 %v661_v7  ;;  %v769_v7 = vor.u32 %v885_v0, %v768_v61  ;;  %v602_v60 = vld [vmem:[#allocation5 + $0x30] sm:$0xf0]  ;;  %v608_v61 = vld [vmem:[#allocation5 + $0x18] sm:$0xf]  ;;  %v610_v0 = vld [vmem:[#allocation5 + $0x38] sm:$0xf0] }
  0x3f   :  { %464 = vmatpush.bf16.xpose.msra.mxu0 %v617_v16  ;;  %477 = vmatpush.bf16.xpose.msra.mxu1 %v621_v17  ;;  %v738_v16 = vld [vmem:[#allocation5 + $0x138] sm:$0xf0]  ;;  %v729_v17 = vor.u32 %v876_v10, %v728_v9 }
  0x40   :  { %490 = vmatpush.bf16.xpose.msra.mxu2 %v625_v18  ;;  %v733_v18 = vor.u32 %v872_v11, %v730_v12  ;;  %v741_v20 = vor.u32 %v873_v15, %v738_v16 }
  0x41   :  { %503 = vmatpush.bf16.xpose.msra.mxu3 %v629_v19  ;;  %v737_v19 = vor.u32 %v877_v14, %v736_v13 }
  0x47   :  { %465 = vmatpush.bf16.xpose.msra.mxu0 %v585_v31  ;;  %478 = vmatpush.bf16.xpose.msra.mxu1 %v589_v35  ;;  %v705_v31 = vor.u32 %v869_v26, %v704_v25  ;;  %v856_v35 = vld [vmem:[#allocation5 + $0x94] sm:$0xf] }
  0x48   :  { %491 = vmatpush.bf16.xpose.msra.mxu2 %v593_v36  ;;  %v666_v36 = vld [vmem:[#allocation5 + $0xb0] sm:$0xf0] }
  0x49   :  { %504 = vmatpush.bf16.xpose.msra.mxu3 %v597_v39  ;;  %v857_v39 = vld [vmem:[#allocation5 + $0x9c] sm:$0xf] }
  0x4e   :  { %466 = vmatmul.bf16.vlgmr.msra.gmra.mxu0 %v122_v1  ;;  %479 = vmatmul.bf16.vlgmr.msra.gmra.mxu1 %v123_v2  ;;  %v601_v1 = vor.u32 %v844_v58, %v600_v57  ;;  %v605_v2 = vor.u32 %v840_v59, %v602_v60 }
  0x4f   :  { %510 = vmatpush.bf16.xpose.msrb.mxu0 %v825_v40  ;;  %523 = vmatpush.bf16.xpose.msrb.mxu1 %v829_v41  ;;  %v674_v40 = vld [vmem:[#allocation5 + $0xb8] sm:$0xf0]  ;;  %v665_v41 = vor.u32 %v860_v34, %v664_v33 }
  0x50   :  { %536 = vmatpush.bf16.xpose.msrb.mxu2 %v833_v42  ;;  %505 = vmatmul.bf16.vlgmr.msra.gmra.mxu3 %v125_v63  ;;  %v669_v42 = vor.u32 %v856_v35, %v666_v36  ;;  %v677_v44 = vor.u32 %v857_v39, %v674_v40  ;;  %v841_v63 = vld [vmem:[#allocation5 + $0x1c] sm:$0xf] }
  0x51   :  { %549 = vmatpush.bf16.xpose.msrb.mxu3 %v837_v43  ;;  %492 = vmatmul.bf16.vlgmr.msra.gmra.mxu2 %v124_v62  ;;  %v673_v43 = vor.u32 %v861_v38, %v672_v37  ;;  %v845_v62 = vld [vmem:[#allocation5 + $0x34] sm:$0xf0]  ;;  %v613_v4 = vor.u32 %v841_v63, %v610_v0 }
  0x52   :  { %v609_v3 = vor.u32 %v845_v62, %v608_v61 }
  0x57   :  { %511 = vmatpush.bf16.xpose.msrb.mxu0 %v793_v53  ;;  %524 = vmatpush.bf16.xpose.msrb.mxu1 %v797_v54  ;;  %v633_v53 = vor.u32 %v852_v46, %v632_v45  ;;  %v637_v54 = vor.u32 %v848_v47, %v634_v48 }
  0x58   :  { %537 = vmatpush.bf16.xpose.msrb.mxu2 %v801_v55  ;;  %v641_v55 = vor.u32 %v853_v50, %v640_v49 }
  0x59   :  { %550 = vmatpush.bf16.xpose.msrb.mxu3 %v805_v56  ;;  %v645_v56 = vor.u32 %v849_v51, %v642_v52 }
  0x5f   :  { %512 = vmatpush.bf16.xpose.msrb.mxu0 %v761_v5  ;;  %525 = vmatpush.bf16.xpose.msrb.mxu1 %v765_v6  ;;  %v126_v5 = vld [vmem:[#allocation1 + $0x24] sm:$0xff]  ;;  %v127_v6 = vld [vmem:[#allocation1 + $0x2d] sm:$0xff] }
  0x60   :  { %538 = vmatpush.bf16.xpose.msrb.mxu2 %v769_v7  ;;  %v128_v7 = vld [vmem:[#allocation1 + $0x36] sm:$0xff] }
  0x61   :  { %551 = vmatpush.bf16.xpose.msrb.mxu3 %v773_v8  ;;  %v129_v8 = vld [vmem:[#allocation1 + $0x3f] sm:$0xff] }
  0x67   :  { %513 = vmatpush.bf16.xpose.msrb.mxu0 %v729_v17  ;;  %526 = vmatpush.bf16.xpose.msrb.mxu1 %v733_v18  ;;  %v907_v17 = vld [vmem:[%s1025_s2] ss:$0 sm:$0xff]  ;;  %s571_s2 = sshll.u32 %s1026_s3, 4  ;;  %s572_s2 = int_to_ptr.hbm [resolvable:$true] %s571_s2 }
  0x68   :  { %539 = vmatpush.bf16.xpose.msrb.mxu2 %v737_v19  ;;  %53 = vst [vmem:[#allocation7] sm:$0x3] %v907_v17 }
  0x69   :  { %552 = vmatpush.bf16.xpose.msrb.mxu3 %v741_v20 }
  0x6f   :  { %514 = vmatpush.bf16.xpose.msrb.mxu0 %v697_v29  ;;  %527 = vmatpush.bf16.xpose.msrb.mxu1 %v701_v30  ;;  %v54_v29 = vld [vmem:[#allocation7] sm:$0x3] }
  0x70   :  { %540 = vmatpush.bf16.xpose.msrb.mxu2 %v705_v31 }
  0x71   :  { %553 = vmatpush.bf16.xpose.msrb.mxu3 %v709_v32 }
  0x77   :  { %515 = vmatpush.bf16.xpose.msrb.mxu0 %v665_v41  ;;  %528 = vmatpush.bf16.xpose.msrb.mxu1 %v669_v42 }
  0x78   :  { %541 = vmatpush.bf16.xpose.msrb.mxu2 %v673_v43 }
  0x79   :  { %554 = vmatpush.bf16.xpose.msrb.mxu3 %v677_v44 }
  0x7f   :  { %516 = vmatpush.bf16.xpose.msrb.mxu0 %v633_v53  ;;  %529 = vmatpush.bf16.xpose.msrb.mxu1 %v637_v54 }
  0x80   :  { %542 = vmatpush.bf16.xpose.msrb.mxu2 %v641_v55 }
  0x81   :  { %555 = vmatpush.bf16.xpose.msrb.mxu3 %v645_v56 }
  0x87   :  { %517 = vmatpush.bf16.xpose.msrb.mxu0 %v601_v1  ;;  %530 = vmatpush.bf16.xpose.msrb.mxu1 %v605_v2 }
  0x88   :  { %543 = vmatpush.bf16.xpose.msrb.mxu2 %v609_v3 }
  0x89   :  { %556 = vmatpush.bf16.xpose.msrb.mxu3 %v613_v4 }
  0x8e   :  { %518 = vmatmul.bf16.vlgmr.msrb.gmra.mxu0 %v126_v5  ;;  %531 = vmatmul.bf16.vlgmr.msrb.gmra.mxu1 %v127_v6 }
  0x8f   :  { %544 = vmatmul.bf16.vlgmr.msrb.gmra.mxu2 %v128_v7 }
  0x90   :  { %557 = vmatmul.bf16.vlgmr.msrb.gmra.mxu3 %v129_v8 }
  0xcb   :  { %v467_v9 = vpop.f32.mrf.mxu0  ;;  %v480_v10 = vpop.f32.mrf.mxu1 }
  0xcc   :  { %v481_v18 = vadd.f32 %v480_v10, %v467_v9 }
  0xd3   :  { %v506_v12 = vpop.f32.mrf.mxu3  ;;  %v469_v13 = vpop.f32.mrf.mxu0 }
  0xd4   :  { %v493_v11 = vpop.f32.mrf.mxu2  ;;  %v482_v14 = vpop.f32.mrf.mxu1 }
  0xd5   :  { %v494_v19 = vadd.f32 %v493_v11, %v481_v18 }
  0xd7   :  { %v507_v20 = vadd.f32 %v506_v12, %v494_v19 }
  0xdb   :  { %v508_v16 = vpop.f32.mrf.mxu3 }
  0xdc   :  { %v495_v15 = vpop.f32.mrf.mxu2 }
 0x10b   :  { %v519_v21 = vpop.f32.mrf.mxu0  ;;  %v532_v22 = vpop.f32.mrf.mxu1 }
 0x10c   :  { %v520_v23 = vadd.f32 %v519_v21, %v507_v20 }
 0x10e   :  { %v533_v24 = vadd.f32 %v532_v22, %v520_v23 }
 0x112   :  { %v545_v25 = vpop.f32.mrf.mxu2 }
 0x113   :  { %v546_v26 = vadd.f32 %v545_v25, %v533_v24  ;;  %v558_v27 = vpop.f32.mrf.mxu3  ;;  %v521_v28 = vpop.f32.mrf.mxu0 }
 0x114   :  { %v534_v30 = vpop.f32.mrf.mxu1 }
 0x115   :  { %v559_v31 = vadd.f32 %v558_v27, %v546_v26 }
 0x117   :  { %v562_v32 = vadd.f32 %v559_v31, %v54_v29 }
 0x119   :  { %563 = vst [vmem:[#allocation7] sm:$0x3] %v562_v32 }
 0x11a   :  { %v547_v33 = vpop.f32.mrf.mxu2  ;;  %574 = dma.vmem_to_hbm [thread:$0]  %s570_s25, 32, %s572_s2, [#allocation4]  }
 0x11b   :  { %v560_v34 = vpop.f32.mrf.mxu3 }
 0x11c   :  { %984 = dma.done.wait [#allocation4], 32  }
 0x11d   :  { %985 = vsyncadd [#allocation4], 4294967264 }
 0x11e   :  { %579 = vsyncpa [#allocation3], 1 }
 0x11f   :  { %580 = vsyncpa [#allocation6], 1 }
 0x120   :  { %581 = vsyncpa [#allocation4], 1 }

</bundles_post_ra>
